<compile_context>
chip_gen: v5e
topology: v5e:2x2
jax: 0.10.0
libtpu: 0.0.40
codegen_flags: <defaults>
</compile_context>

<pallas_src>
import jax
import jax.numpy as jnp
from jax.experimental import pallas as pl
from jax.experimental.pallas import tpu as pltpu


def _logish(v):
    # v is the f32 accumulator.  Logish(x) = x * log(1 + sigmoid(x)).
    # sigmoid via EUP approx reciprocal (separate issue slot -> nearly free).
    sig = pl.reciprocal(1.0 + jnp.exp(-v), approx=True)
    return v * jnp.log(1.0 + sig)


def _mlp_logish_kernel(x_ref, w_in_ref, b_in_ref, w_hid_ref, b_hid_ref,
                       w_out_ref, b_out_ref, o_ref):
    # Input tile (tm, 784) is already bf16; first dot consumes it directly,
    # accumulating in f32 on the MXU.
    h = _logish(
        jnp.dot(x_ref[...], w_in_ref[...], preferred_element_type=jnp.float32)
        + b_in_ref[...]
    )

    # Hidden layers 2..8: 128 -> 128, statically unrolled.  Activations are
    # cast to bf16 right before each matmul; Logish epilogue stays in f32.
    for i in range(w_hid_ref.shape[0]):
        h = _logish(
            jnp.dot(h.astype(jnp.bfloat16), w_hid_ref[i],
                    preferred_element_type=jnp.float32)
            + b_hid_ref[i]
        )

    # Output layer: 128 -> 10, no activation.
    out = (jnp.dot(h.astype(jnp.bfloat16), w_out_ref[...],
                   preferred_element_type=jnp.float32)
           + b_out_ref[...])
    o_ref[...] = out.astype(o_ref.dtype)


def simple_mlp_logish(x, params, *, batch_tile=1024):
    """Forward pass of SimpleMLP_Logish.

    x: (B, 1, 28, 28) (or any (B, ...) flattening to 784).
    params = (w_in (784,128), b_in (1,128),
              w_hid (7,128,128), b_hid (7,1,128),
              w_out (128,10), b_out (1,10))
    Weights are (in_features, out_features), i.e. transposed nn.Linear layout,
    so the kernel computes h @ W + b.
    """
    w_in, b_in, w_hid, b_hid, w_out, b_out = params
    B = x.shape[0]
    out_dtype = x.dtype
    x2d = x.reshape(B, -1).astype(jnp.bfloat16)          # nn.Flatten, bf16 feed
    d_in = x2d.shape[1]
    width = w_in.shape[1]
    n_hid = w_hid.shape[0]
    d_out = w_out.shape[1]

    # bf16 weights for the MXU (f32 accumulation in-kernel); biases stay f32.
    w_in_b = w_in.astype(jnp.bfloat16)
    w_hid_b = w_hid.astype(jnp.bfloat16)
    w_out_b = w_out.astype(jnp.bfloat16)
    b_in_f = b_in.astype(jnp.float32)
    b_hid_f = b_hid.astype(jnp.float32)
    b_out_f = b_out.astype(jnp.float32)

    # Batch tile: full batch if tiny; otherwise guarantee >= 2 grid steps so
    # the "parallel" batch axis actually shards across v7x's 2 TensorCores,
    # rounded up to the 8-row sublane granule, capped at batch_tile.
    if B <= 8:
        tm = B
    else:
        half = pl.cdiv(B, 2)
        half = ((half + 7) // 8) * 8
        tm = min(batch_tile, half)
    grid = (pl.cdiv(B, tm),)

    n_params = (d_in * width + n_hid * width * width + width * d_out)
    cost = pl.CostEstimate(
        flops=2 * B * (d_in * width + n_hid * width * width + width * d_out),
        transcendentals=3 * B * (n_hid + 1) * width,      # exp, recip, log
        bytes_accessed=(B * d_in * 2                      # bf16 input
                        + B * d_out * jnp.dtype(out_dtype).itemsize
                        + n_params * 2                    # bf16 weights
                        + (width * (n_hid + 1) + d_out) * 4),  # f32 biases
    )

    return pl.pallas_call(
        _mlp_logish_kernel,
        out_shape=jax.ShapeDtypeStruct((B, d_out), out_dtype),
        grid_spec=pltpu.PrefetchScalarGridSpec(
            num_scalar_prefetch=0,
            grid=grid,
            in_specs=[
                pl.BlockSpec((tm, d_in), lambda i: (i, 0)),               # x tile
                pl.BlockSpec((d_in, width), lambda i: (0, 0)),            # W1
                pl.BlockSpec((1, width), lambda i: (0, 0)),               # b1
                pl.BlockSpec((n_hid, width, width), lambda i: (0, 0, 0)),  # W2..8
                pl.BlockSpec((n_hid, 1, width), lambda i: (0, 0, 0)),      # b2..8
                pl.BlockSpec((width, d_out), lambda i: (0, 0)),           # W9
                pl.BlockSpec((1, d_out), lambda i: (0, 0)),               # b9
            ],
            out_specs=pl.BlockSpec((tm, d_out), lambda i: (i, 0)),
        ),
        compiler_params=pltpu.CompilerParams(
            dimension_semantics=("parallel",),
            vmem_limit_bytes=32 * 1024 * 1024,
        ),
        cost_estimate=cost,
    )(x2d, w_in_b, b_in_f, w_hid_b, b_hid_f, w_out_b, b_out_f)


if __name__ == "__main__":
    WIDTH = 128
    D_IN = 28 * 28
    D_OUT = 10
    N_HID = 7          # Linear(128,128) layers between the first and last
    B = 8              # small MNIST-like batch

    key = jax.random.PRNGKey(0)
    keys = jax.random.split(key, 2 + 2 * (N_HID + 2))

    x = jax.random.normal(keys[0], (B, 1, 28, 28), dtype=jnp.float32)

    def init_linear(kw, kb, fan_in, fan_out):
        bound = 1.0 / (fan_in ** 0.5)
        w = jax.random.uniform(kw, (fan_in, fan_out), jnp.float32, -bound, bound)
        b = jax.random.uniform(kb, (1, fan_out), jnp.float32, -bound, bound)
        return w, b

    w_in, b_in = init_linear(keys[1], keys[2], D_IN, WIDTH)
    hid = [init_linear(keys[3 + 2 * i], keys[4 + 2 * i], WIDTH, WIDTH)
           for i in range(N_HID)]
    w_hid = jnp.stack([w for w, _ in hid])            # (7, 128, 128)
    b_hid = jnp.stack([b for _, b in hid])            # (7, 1, 128)
    w_out, b_out = init_linear(keys[3 + 2 * N_HID], keys[4 + 2 * N_HID],
                               WIDTH, D_OUT)

    params = (w_in, b_in, w_hid, b_hid, w_out, b_out)

    y = simple_mlp_logish(x, params)
    jax.block_until_ready(y)

    # Pure-JAX f32 reference of the same forward pass.
    def logish_ref(v):
        return v * jnp.log(1.0 + jax.nn.sigmoid(v))

    h = x.reshape(B, -1)
    h = logish_ref(h @ w_in + b_in)
    for i in range(N_HID):
        h = logish_ref(h @ w_hid[i] + b_hid[i])
    y_ref = h @ w_out + b_out

    assert y.shape == (B, D_OUT) and y.dtype == x.dtype
    assert jnp.allclose(y, y_ref, atol=3e-2, rtol=5e-2), (
        float(jnp.max(jnp.abs(y - y_ref))))

    print("KERNEL_OK")
</pallas_src>

<mosaic_0001>
module attributes {stable_mosaic.version = 11 : i64} {
  func.func @_mlp_logish_kernel(%arg0: i32, %arg1: memref<8x784xbf16, #tpu.memory_space<vmem>>, %arg2: memref<784x128xbf16, #tpu.memory_space<vmem>>, %arg3: memref<1x128xf32, #tpu.memory_space<vmem>>, %arg4: memref<7x128x128xbf16, #tpu.memory_space<vmem>>, %arg5: memref<7x1x128xf32, #tpu.memory_space<vmem>>, %arg6: memref<128x10xbf16, #tpu.memory_space<vmem>>, %arg7: memref<1x10xf32, #tpu.memory_space<vmem>>, %arg8: memref<8x10xf32, #tpu.memory_space<vmem>>) attributes {dimension_semantics = [#tpu.dimension_semantics<parallel>], iteration_bounds = array<i64: 1>, scalar_prefetch = 0 : i64, scratch_operands = 0 : i64, tpu.core_type = #tpu.core_type<tc>, window_params = [{transform_indices = @transform_0, window_bounds = array<i64: 8, 784>}, {pipeline_mode = #tpu.pipeline_mode<synchronous>, transform_indices = @transform_1, window_bounds = array<i64: 784, 128>}, {pipeline_mode = #tpu.pipeline_mode<synchronous>, transform_indices = @transform_2, window_bounds = array<i64: 1, 128>}, {pipeline_mode = #tpu.pipeline_mode<synchronous>, transform_indices = @transform_3, window_bounds = array<i64: 7, 128, 128>}, {pipeline_mode = #tpu.pipeline_mode<synchronous>, transform_indices = @transform_4, window_bounds = array<i64: 7, 1, 128>}, {pipeline_mode = #tpu.pipeline_mode<synchronous>, transform_indices = @transform_5, window_bounds = array<i64: 128, 10>}, {pipeline_mode = #tpu.pipeline_mode<synchronous>, transform_indices = @transform_6, window_bounds = array<i64: 1, 10>}, {transform_indices = @transform_7, window_bounds = array<i64: 8, 10>}]} {
    %c0 = arith.constant 0 : index
    %c0_0 = arith.constant 0 : index
    %0 = vector.load %arg1[%c0, %c0_0] : memref<8x784xbf16, #tpu.memory_space<vmem>>, vector<8x784xbf16>
    %c0_1 = arith.constant 0 : index
    %c0_2 = arith.constant 0 : index
    %1 = vector.load %arg2[%c0_1, %c0_2] : memref<784x128xbf16, #tpu.memory_space<vmem>>, vector<784x128xbf16>
    %cst = arith.constant dense<0.000000e+00> : vector<8x128xf32>
    %2 = tpu.matmul %0, %1, %cst {dimension_numbers = #tpu.dot_dimension_numbers<[1], [0], [0], [1], [0, 0, 1, 1], [], []>} : vector<8x784xbf16>, vector<784x128xbf16>, vector<8x128xf32> -> vector<8x128xf32>
    %c0_3 = arith.constant 0 : index
    %c0_4 = arith.constant 0 : index
    %3 = vector.load %arg3[%c0_3, %c0_4] : memref<1x128xf32, #tpu.memory_space<vmem>>, vector<1x128xf32>
    %4 = vector.broadcast %3 : vector<1x128xf32> to vector<8x128xf32>
    %5 = arith.addf %2, %4 : vector<8x128xf32>
    %cst_5 = arith.constant 0.000000e+00 : f32
    %6 = vector.broadcast %cst_5 : f32 to vector<8x128xf32>
    %7 = arith.subf %6, %5 : vector<8x128xf32>
    %8 = math.exp %7 : vector<8x128xf32>
    %cst_6 = arith.constant 1.000000e+00 : f32
    %9 = vector.broadcast %cst_6 : f32 to vector<8x128xf32>
    %10 = arith.addf %9, %8 : vector<8x128xf32>
    %11 = tpu.reciprocal %10 {approx = true} : vector<8x128xf32> -> vector<8x128xf32>
    %cst_7 = arith.constant 1.000000e+00 : f32
    %12 = vector.broadcast %cst_7 : f32 to vector<8x128xf32>
    %13 = arith.addf %12, %11 : vector<8x128xf32>
    %14 = math.log %13 : vector<8x128xf32>
    %15 = arith.mulf %5, %14 : vector<8x128xf32>
    %16 = arith.truncf %15 : vector<8x128xf32> to vector<8x128xbf16>
    %c0_8 = arith.constant 0 : index
    %c0_9 = arith.constant 0 : index
    %c0_10 = arith.constant 0 : index
    %17 = vector.load %arg4[%c0_8, %c0_9, %c0_10] : memref<7x128x128xbf16, #tpu.memory_space<vmem>>, vector<1x128x128xbf16>
    %18 = vector.shape_cast %17 : vector<1x128x128xbf16> to vector<128x128xbf16>
    %cst_11 = arith.constant dense<0.000000e+00> : vector<8x128xf32>
    %19 = tpu.matmul %16, %18, %cst_11 {dimension_numbers = #tpu.dot_dimension_numbers<[1], [0], [0], [1], [0, 0, 1, 1], [], []>} : vector<8x128xbf16>, vector<128x128xbf16>, vector<8x128xf32> -> vector<8x128xf32>
    %c0_12 = arith.constant 0 : index
    %c0_13 = arith.constant 0 : index
    %c0_14 = arith.constant 0 : index
    %20 = vector.load %arg5[%c0_12, %c0_13, %c0_14] : memref<7x1x128xf32, #tpu.memory_space<vmem>>, vector<1x1x128xf32>
    %21 = vector.shape_cast %20 : vector<1x1x128xf32> to vector<1x128xf32>
    %22 = vector.broadcast %21 : vector<1x128xf32> to vector<8x128xf32>
    %23 = arith.addf %19, %22 : vector<8x128xf32>
    %cst_15 = arith.constant 0.000000e+00 : f32
    %24 = vector.broadcast %cst_15 : f32 to vector<8x128xf32>
    %25 = arith.subf %24, %23 : vector<8x128xf32>
    %26 = math.exp %25 : vector<8x128xf32>
    %cst_16 = arith.constant 1.000000e+00 : f32
    %27 = vector.broadcast %cst_16 : f32 to vector<8x128xf32>
    %28 = arith.addf %27, %26 : vector<8x128xf32>
    %29 = tpu.reciprocal %28 {approx = true} : vector<8x128xf32> -> vector<8x128xf32>
    %cst_17 = arith.constant 1.000000e+00 : f32
    %30 = vector.broadcast %cst_17 : f32 to vector<8x128xf32>
    %31 = arith.addf %30, %29 : vector<8x128xf32>
    %32 = math.log %31 : vector<8x128xf32>
    %33 = arith.mulf %23, %32 : vector<8x128xf32>
    %34 = arith.truncf %33 : vector<8x128xf32> to vector<8x128xbf16>
    %c1 = arith.constant 1 : index
    %c0_18 = arith.constant 0 : index
    %c0_19 = arith.constant 0 : index
    %35 = vector.load %arg4[%c1, %c0_18, %c0_19] : memref<7x128x128xbf16, #tpu.memory_space<vmem>>, vector<1x128x128xbf16>
    %36 = vector.shape_cast %35 : vector<1x128x128xbf16> to vector<128x128xbf16>
    %cst_20 = arith.constant dense<0.000000e+00> : vector<8x128xf32>
    %37 = tpu.matmul %34, %36, %cst_20 {dimension_numbers = #tpu.dot_dimension_numbers<[1], [0], [0], [1], [0, 0, 1, 1], [], []>} : vector<8x128xbf16>, vector<128x128xbf16>, vector<8x128xf32> -> vector<8x128xf32>
    %c1_21 = arith.constant 1 : index
    %c0_22 = arith.constant 0 : index
    %c0_23 = arith.constant 0 : index
    %38 = vector.load %arg5[%c1_21, %c0_22, %c0_23] : memref<7x1x128xf32, #tpu.memory_space<vmem>>, vector<1x1x128xf32>
    %39 = vector.shape_cast %38 : vector<1x1x128xf32> to vector<1x128xf32>
    %40 = vector.broadcast %39 : vector<1x128xf32> to vector<8x128xf32>
    %41 = arith.addf %37, %40 : vector<8x128xf32>
    %cst_24 = arith.constant 0.000000e+00 : f32
    %42 = vector.broadcast %cst_24 : f32 to vector<8x128xf32>
    %43 = arith.subf %42, %41 : vector<8x128xf32>
    %44 = math.exp %43 : vector<8x128xf32>
    %cst_25 = arith.constant 1.000000e+00 : f32
    %45 = vector.broadcast %cst_25 : f32 to vector<8x128xf32>
    %46 = arith.addf %45, %44 : vector<8x128xf32>
    %47 = tpu.reciprocal %46 {approx = true} : vector<8x128xf32> -> vector<8x128xf32>
    %cst_26 = arith.constant 1.000000e+00 : f32
    %48 = vector.broadcast %cst_26 : f32 to vector<8x128xf32>
    %49 = arith.addf %48, %47 : vector<8x128xf32>
    %50 = math.log %49 : vector<8x128xf32>
    %51 = arith.mulf %41, %50 : vector<8x128xf32>
    %52 = arith.truncf %51 : vector<8x128xf32> to vector<8x128xbf16>
    %c2 = arith.constant 2 : index
    %c0_27 = arith.constant 0 : index
    %c0_28 = arith.constant 0 : index
    %53 = vector.load %arg4[%c2, %c0_27, %c0_28] : memref<7x128x128xbf16, #tpu.memory_space<vmem>>, vector<1x128x128xbf16>
    %54 = vector.shape_cast %53 : vector<1x128x128xbf16> to vector<128x128xbf16>
    %cst_29 = arith.constant dense<0.000000e+00> : vector<8x128xf32>
    %55 = tpu.matmul %52, %54, %cst_29 {dimension_numbers = #tpu.dot_dimension_numbers<[1], [0], [0], [1], [0, 0, 1, 1], [], []>} : vector<8x128xbf16>, vector<128x128xbf16>, vector<8x128xf32> -> vector<8x128xf32>
    %c2_30 = arith.constant 2 : index
    %c0_31 = arith.constant 0 : index
    %c0_32 = arith.constant 0 : index
    %56 = vector.load %arg5[%c2_30, %c0_31, %c0_32] : memref<7x1x128xf32, #tpu.memory_space<vmem>>, vector<1x1x128xf32>
    %57 = vector.shape_cast %56 : vector<1x1x128xf32> to vector<1x128xf32>
    %58 = vector.broadcast %57 : vector<1x128xf32> to vector<8x128xf32>
    %59 = arith.addf %55, %58 : vector<8x128xf32>
    %cst_33 = arith.constant 0.000000e+00 : f32
    %60 = vector.broadcast %cst_33 : f32 to vector<8x128xf32>
    %61 = arith.subf %60, %59 : vector<8x128xf32>
    %62 = math.exp %61 : vector<8x128xf32>
    %cst_34 = arith.constant 1.000000e+00 : f32
    %63 = vector.broadcast %cst_34 : f32 to vector<8x128xf32>
    %64 = arith.addf %63, %62 : vector<8x128xf32>
    %65 = tpu.reciprocal %64 {approx = true} : vector<8x128xf32> -> vector<8x128xf32>
    %cst_35 = arith.constant 1.000000e+00 : f32
    %66 = vector.broadcast %cst_35 : f32 to vector<8x128xf32>
    %67 = arith.addf %66, %65 : vector<8x128xf32>
    %68 = math.log %67 : vector<8x128xf32>
    %69 = arith.mulf %59, %68 : vector<8x128xf32>
    %70 = arith.truncf %69 : vector<8x128xf32> to vector<8x128xbf16>
    %c3 = arith.constant 3 : index
    %c0_36 = arith.constant 0 : index
    %c0_37 = arith.constant 0 : index
    %71 = vector.load %arg4[%c3, %c0_36, %c0_37] : memref<7x128x128xbf16, #tpu.memory_space<vmem>>, vector<1x128x128xbf16>
    %72 = vector.shape_cast %71 : vector<1x128x128xbf16> to vector<128x128xbf16>
    %cst_38 = arith.constant dense<0.000000e+00> : vector<8x128xf32>
    %73 = tpu.matmul %70, %72, %cst_38 {dimension_numbers = #tpu.dot_dimension_numbers<[1], [0], [0], [1], [0, 0, 1, 1], [], []>} : vector<8x128xbf16>, vector<128x128xbf16>, vector<8x128xf32> -> vector<8x128xf32>
    %c3_39 = arith.constant 3 : index
    %c0_40 = arith.constant 0 : index
    %c0_41 = arith.constant 0 : index
    %74 = vector.load %arg5[%c3_39, %c0_40, %c0_41] : memref<7x1x128xf32, #tpu.memory_space<vmem>>, vector<1x1x128xf32>
    %75 = vector.shape_cast %74 : vector<1x1x128xf32> to vector<1x128xf32>
    %76 = vector.broadcast %75 : vector<1x128xf32> to vector<8x128xf32>
    %77 = arith.addf %73, %76 : vector<8x128xf32>
    %cst_42 = arith.constant 0.000000e+00 : f32
    %78 = vector.broadcast %cst_42 : f32 to vector<8x128xf32>
    %79 = arith.subf %78, %77 : vector<8x128xf32>
    %80 = math.exp %79 : vector<8x128xf32>
    %cst_43 = arith.constant 1.000000e+00 : f32
    %81 = vector.broadcast %cst_43 : f32 to vector<8x128xf32>
    %82 = arith.addf %81, %80 : vector<8x128xf32>
    %83 = tpu.reciprocal %82 {approx = true} : vector<8x128xf32> -> vector<8x128xf32>
    %cst_44 = arith.constant 1.000000e+00 : f32
    %84 = vector.broadcast %cst_44 : f32 to vector<8x128xf32>
    %85 = arith.addf %84, %83 : vector<8x128xf32>
    %86 = math.log %85 : vector<8x128xf32>
    %87 = arith.mulf %77, %86 : vector<8x128xf32>
    %88 = arith.truncf %87 : vector<8x128xf32> to vector<8x128xbf16>
    %c4 = arith.constant 4 : index
    %c0_45 = arith.constant 0 : index
    %c0_46 = arith.constant 0 : index
    %89 = vector.load %arg4[%c4, %c0_45, %c0_46] : memref<7x128x128xbf16, #tpu.memory_space<vmem>>, vector<1x128x128xbf16>
    %90 = vector.shape_cast %89 : vector<1x128x128xbf16> to vector<128x128xbf16>
    %cst_47 = arith.constant dense<0.000000e+00> : vector<8x128xf32>
    %91 = tpu.matmul %88, %90, %cst_47 {dimension_numbers = #tpu.dot_dimension_numbers<[1], [0], [0], [1], [0, 0, 1, 1], [], []>} : vector<8x128xbf16>, vector<128x128xbf16>, vector<8x128xf32> -> vector<8x128xf32>
    %c4_48 = arith.constant 4 : index
    %c0_49 = arith.constant 0 : index
    %c0_50 = arith.constant 0 : index
    %92 = vector.load %arg5[%c4_48, %c0_49, %c0_50] : memref<7x1x128xf32, #tpu.memory_space<vmem>>, vector<1x1x128xf32>
    %93 = vector.shape_cast %92 : vector<1x1x128xf32> to vector<1x128xf32>
    %94 = vector.broadcast %93 : vector<1x128xf32> to vector<8x128xf32>
    %95 = arith.addf %91, %94 : vector<8x128xf32>
    %cst_51 = arith.constant 0.000000e+00 : f32
    %96 = vector.broadcast %cst_51 : f32 to vector<8x128xf32>
    %97 = arith.subf %96, %95 : vector<8x128xf32>
    %98 = math.exp %97 : vector<8x128xf32>
    %cst_52 = arith.constant 1.000000e+00 : f32
    %99 = vector.broadcast %cst_52 : f32 to vector<8x128xf32>
    %100 = arith.addf %99, %98 : vector<8x128xf32>
    %101 = tpu.reciprocal %100 {approx = true} : vector<8x128xf32> -> vector<8x128xf32>
    %cst_53 = arith.constant 1.000000e+00 : f32
    %102 = vector.broadcast %cst_53 : f32 to vector<8x128xf32>
    %103 = arith.addf %102, %101 : vector<8x128xf32>
    %104 = math.log %103 : vector<8x128xf32>
    %105 = arith.mulf %95, %104 : vector<8x128xf32>
    %106 = arith.truncf %105 : vector<8x128xf32> to vector<8x128xbf16>
    %c5 = arith.constant 5 : index
    %c0_54 = arith.constant 0 : index
    %c0_55 = arith.constant 0 : index
    %107 = vector.load %arg4[%c5, %c0_54, %c0_55] : memref<7x128x128xbf16, #tpu.memory_space<vmem>>, vector<1x128x128xbf16>
    %108 = vector.shape_cast %107 : vector<1x128x128xbf16> to vector<128x128xbf16>
    %cst_56 = arith.constant dense<0.000000e+00> : vector<8x128xf32>
    %109 = tpu.matmul %106, %108, %cst_56 {dimension_numbers = #tpu.dot_dimension_numbers<[1], [0], [0], [1], [0, 0, 1, 1], [], []>} : vector<8x128xbf16>, vector<128x128xbf16>, vector<8x128xf32> -> vector<8x128xf32>
    %c5_57 = arith.constant 5 : index
    %c0_58 = arith.constant 0 : index
    %c0_59 = arith.constant 0 : index
    %110 = vector.load %arg5[%c5_57, %c0_58, %c0_59] : memref<7x1x128xf32, #tpu.memory_space<vmem>>, vector<1x1x128xf32>
    %111 = vector.shape_cast %110 : vector<1x1x128xf32> to vector<1x128xf32>
    %112 = vector.broadcast %111 : vector<1x128xf32> to vector<8x128xf32>
    %113 = arith.addf %109, %112 : vector<8x128xf32>
    %cst_60 = arith.constant 0.000000e+00 : f32
    %114 = vector.broadcast %cst_60 : f32 to vector<8x128xf32>
    %115 = arith.subf %114, %113 : vector<8x128xf32>
    %116 = math.exp %115 : vector<8x128xf32>
    %cst_61 = arith.constant 1.000000e+00 : f32
    %117 = vector.broadcast %cst_61 : f32 to vector<8x128xf32>
    %118 = arith.addf %117, %116 : vector<8x128xf32>
    %119 = tpu.reciprocal %118 {approx = true} : vector<8x128xf32> -> vector<8x128xf32>
    %cst_62 = arith.constant 1.000000e+00 : f32
    %120 = vector.broadcast %cst_62 : f32 to vector<8x128xf32>
    %121 = arith.addf %120, %119 : vector<8x128xf32>
    %122 = math.log %121 : vector<8x128xf32>
    %123 = arith.mulf %113, %122 : vector<8x128xf32>
    %124 = arith.truncf %123 : vector<8x128xf32> to vector<8x128xbf16>
    %c6 = arith.constant 6 : index
    %c0_63 = arith.constant 0 : index
    %c0_64 = arith.constant 0 : index
    %125 = vector.load %arg4[%c6, %c0_63, %c0_64] : memref<7x128x128xbf16, #tpu.memory_space<vmem>>, vector<1x128x128xbf16>
    %126 = vector.shape_cast %125 : vector<1x128x128xbf16> to vector<128x128xbf16>
    %cst_65 = arith.constant dense<0.000000e+00> : vector<8x128xf32>
    %127 = tpu.matmul %124, %126, %cst_65 {dimension_numbers = #tpu.dot_dimension_numbers<[1], [0], [0], [1], [0, 0, 1, 1], [], []>} : vector<8x128xbf16>, vector<128x128xbf16>, vector<8x128xf32> -> vector<8x128xf32>
    %c6_66 = arith.constant 6 : index
    %c0_67 = arith.constant 0 : index
    %c0_68 = arith.constant 0 : index
    %128 = vector.load %arg5[%c6_66, %c0_67, %c0_68] : memref<7x1x128xf32, #tpu.memory_space<vmem>>, vector<1x1x128xf32>
    %129 = vector.shape_cast %128 : vector<1x1x128xf32> to vector<1x128xf32>
    %130 = vector.broadcast %129 : vector<1x128xf32> to vector<8x128xf32>
    %131 = arith.addf %127, %130 : vector<8x128xf32>
    %cst_69 = arith.constant 0.000000e+00 : f32
    %132 = vector.broadcast %cst_69 : f32 to vector<8x128xf32>
    %133 = arith.subf %132, %131 : vector<8x128xf32>
    %134 = math.exp %133 : vector<8x128xf32>
    %cst_70 = arith.constant 1.000000e+00 : f32
    %135 = vector.broadcast %cst_70 : f32 to vector<8x128xf32>
    %136 = arith.addf %135, %134 : vector<8x128xf32>
    %137 = tpu.reciprocal %136 {approx = true} : vector<8x128xf32> -> vector<8x128xf32>
    %cst_71 = arith.constant 1.000000e+00 : f32
    %138 = vector.broadcast %cst_71 : f32 to vector<8x128xf32>
    %139 = arith.addf %138, %137 : vector<8x128xf32>
    %140 = math.log %139 : vector<8x128xf32>
    %141 = arith.mulf %131, %140 : vector<8x128xf32>
    %142 = arith.truncf %141 : vector<8x128xf32> to vector<8x128xbf16>
    %c0_72 = arith.constant 0 : index
    %c0_73 = arith.constant 0 : index
    %143 = vector.load %arg6[%c0_72, %c0_73] : memref<128x10xbf16, #tpu.memory_space<vmem>>, vector<128x10xbf16>
    %cst_74 = arith.constant dense<0.000000e+00> : vector<8x10xf32>
    %144 = tpu.matmul %142, %143, %cst_74 {dimension_numbers = #tpu.dot_dimension_numbers<[1], [0], [0], [1], [0, 0, 1, 1], [], []>} : vector<8x128xbf16>, vector<128x10xbf16>, vector<8x10xf32> -> vector<8x10xf32>
    %c0_75 = arith.constant 0 : index
    %c0_76 = arith.constant 0 : index
    %145 = vector.load %arg7[%c0_75, %c0_76] : memref<1x10xf32, #tpu.memory_space<vmem>>, vector<1x10xf32>
    %146 = vector.broadcast %145 : vector<1x10xf32> to vector<8x10xf32>
    %147 = arith.addf %144, %146 : vector<8x10xf32>
    %c0_77 = arith.constant 0 : index
    %c0_78 = arith.constant 0 : index
    %148 = vector.load %arg8[%c0_77, %c0_78] : memref<8x10xf32, #tpu.memory_space<vmem>>, vector<8x10xf32>
    tpu.vector_store %arg8[%c0_77, %c0_78], %147 {strides = array<i32>} : memref<8x10xf32, #tpu.memory_space<vmem>>, vector<8x10xf32>,
    return
  }
  func.func @transform_0(%arg0: i32) -> (i32, i32) {
    %c0_i32 = arith.constant 0 : i32
    %c0_i32_0 = arith.constant 0 : i32
    return %arg0, %c0_i32 : i32, i32
  }
  func.func @transform_1(%arg0: i32) -> (i32, i32) {
    %c0_i32 = arith.constant 0 : i32
    %c0_i32_0 = arith.constant 0 : i32
    %c0_i32_1 = arith.constant 0 : i32
    return %c0_i32, %c0_i32_0 : i32, i32
  }
  func.func @transform_2(%arg0: i32) -> (i32, i32) {
    %c0_i32 = arith.constant 0 : i32
    %c0_i32_0 = arith.constant 0 : i32
    %c0_i32_1 = arith.constant 0 : i32
    return %c0_i32, %c0_i32_0 : i32, i32
  }
  func.func @transform_3(%arg0: i32) -> (i32, i32, i32) {
    %c0_i32 = arith.constant 0 : i32
    %c0_i32_0 = arith.constant 0 : i32
    %c0_i32_1 = arith.constant 0 : i32
    %c0_i32_2 = arith.constant 0 : i32
    return %c0_i32, %c0_i32_0, %c0_i32_1 : i32, i32, i32
  }
  func.func @transform_4(%arg0: i32) -> (i32, i32, i32) {
    %c0_i32 = arith.constant 0 : i32
    %c0_i32_0 = arith.constant 0 : i32
    %c0_i32_1 = arith.constant 0 : i32
    %c0_i32_2 = arith.constant 0 : i32
    return %c0_i32, %c0_i32_0, %c0_i32_1 : i32, i32, i32
  }
  func.func @transform_5(%arg0: i32) -> (i32, i32) {
    %c0_i32 = arith.constant 0 : i32
    %c0_i32_0 = arith.constant 0 : i32
    %c0_i32_1 = arith.constant 0 : i32
    return %c0_i32, %c0_i32_0 : i32, i32
  }
  func.func @transform_6(%arg0: i32) -> (i32, i32) {
    %c0_i32 = arith.constant 0 : i32
    %c0_i32_0 = arith.constant 0 : i32
    %c0_i32_1 = arith.constant 0 : i32
    return %c0_i32, %c0_i32_0 : i32, i32
  }
  func.func @transform_7(%arg0: i32) -> (i32, i32) {
    %c0_i32 = arith.constant 0 : i32
    %c0_i32_0 = arith.constant 0 : i32
    return %arg0, %c0_i32 : i32, i32
  }
}

</mosaic_0001>

<bundles_post_ra>
// kernel: tpu_custom_call.1
= control target key start
LH: loop header
LB: loop body
LE: loop exit
PB: predicated region body
PF: predicated region fallthrough
CT: control target
= control target key end

     0   :  { %12 = vsyncpa [#allocation3], 0  ;;  %s2168_s0 = inlined_call_operand.vmem [shape: bf16[8,784], index: 0, kind: input, shape index: {}]   ;;  %s2169_s1 = inlined_call_operand.hbm [shape: bf16[784,128], index: 1, kind: input, shape index: {}]   ;;  %s2170_s2 = inlined_call_operand.vmem [shape: f32[1,128], index: 2, kind: input, shape index: {}]   ;;  %s2171_s3 = inlined_call_operand.hbm [shape: bf16[7,128,128], index: 3, kind: input, shape index: {}]   ;;  %s2172_s4 = inlined_call_operand.vmem [shape: f32[7,1,128], index: 4, kind: input, shape index: {}]   ;;  %s2173_s5 = inlined_call_operand.vmem [shape: bf16[128,10], index: 5, kind: input, shape index: {}]   ;;  %s2174_s6 = inlined_call_operand.vmem [shape: f32[1,10], index: 6, kind: input, shape index: {}]   ;;  %s2175_s7 = inlined_call_operand.hbm [shape: f32[8,10], index: 7, kind: output, shape index: {}]  }
   0x1   :  { %13 = vsyncpa [#allocation6], 0 }
   0x2   :  { %14 = vsyncpa [#allocation4], 0  ;;  %s21_s26 = sshll.u32 %s2169_s1, 4  ;;  %s2051_s27 = smov [#allocation2]   ;;  %s22_s26 = int_to_ptr.hbm [resolvable:$true] %s21_s26 }
   0x3   :  { %s23_s28 = sshll.u32 %s2051_s27, 4  ;;  %s36_s8 = sshll.u32 %s2171_s3, 4  ;;  %s24_s28 = int_to_ptr.vmem [resolvable:$true] %s23_s28  ;;  %s37_s8 = int_to_ptr.hbm [resolvable:$true] %s36_s8 }
   0x4   :  { %s2052_s9 = smov 64   ;;  %s2053_s10 = smov 4  }
   0x5   :  { %29 = dma.hbm_to_vmem [thread:$0]  %s22_s26, 6272, %s24_s28, [#allocation3], %s2052_s9, %s2052_s9, %s2053_s10  }
   0x6   :  { %s2054_s11 = smov [#allocation5]  }
   0x7   :  { %s38_s12 = sshll.u32 %s2054_s11, 4  ;;  %s39_s12 = int_to_ptr.vmem [resolvable:$true] %s38_s12 }
   0x8   :  { %44 = dma.hbm_to_vmem [thread:$0]  %s37_s8, 7168, %s39_s12, [#allocation6], %s2052_s9, %s2052_s9, %s2053_s10  }
   0x9   :  { %2045 = dma.done.wait [#allocation3], 6272  }
   0xa   :  { %2046 = vsyncadd [#allocation3], 4294961024 }
   0xb   :  { %2047 = dma.done.wait [#allocation6], 7168  }
   0xc   :  { %2048 = vsyncadd [#allocation6], 4294960128  ;;  %v1805_v0 = vld [vmem:[#allocation2 + $0x38] sm:$0xff]  ;;  %v1804_v3 = vld [vmem:[#allocation2 + $0x30] sm:$0xff]  ;;  %vm484_vm0 = vcmask 130048   ;;  %s1328_s26 = sshll.u32 %s2175_s7, 4  ;;  %s1329_s26 = int_to_ptr.hbm [resolvable:$true] %s1328_s26 }
   0xd   :  { %v1813_v1 = vld [vmem:[#allocation2 + $0x78] sm:$0xff]  ;;  %488 = vmatpush.bf16.msra.mxu0 %v1805_v0  ;;  %v1812_v4 = vld [vmem:[#allocation2 + $0x70] sm:$0xff]  ;;  %v1803_v8 = vld [vmem:[#allocation2 + $0x28] sm:$0xff]  ;;  %vm1319_vm1 = vcmask 80896  }
   0xe   :  { %v1821_v2 = vld [vmem:[#allocation2 + $0xb8] sm:$0xff]  ;;  %501 = vmatpush.bf16.msra.mxu1 %v1813_v1  ;;  %v1820_v5 = vld [vmem:[#allocation2 + $0xb0] sm:$0xff]  ;;  %v1811_v9 = vld [vmem:[#allocation2 + $0x68] sm:$0xff] }
   0xf   :  { %514 = vmatpush.bf16.msra.mxu2 %v1821_v2  ;;  %v1829_v6 = vld [vmem:[#allocation2 + $0xf8] sm:$0xff]  ;;  %v1828_v7 = vld [vmem:[#allocation2 + $0xf0] sm:$0xff]  ;;  %v1819_v10 = vld [vmem:[#allocation2 + $0xa8] sm:$0xff] }
  0x10   :  { %527 = vmatpush.bf16.msra.mxu3 %v1829_v6  ;;  %v1827_v11 = vld [vmem:[#allocation2 + $0xe8] sm:$0xff]  ;;  %v1802_v12 = vld [vmem:[#allocation2 + $0x20] sm:$0xff]  ;;  %v1801_v16 = vld [vmem:[#allocation2 + $0x18] sm:$0xff] }
  0x11   :  { %489 = vmatpush.bf16.msra.mxu0 %v1804_v3  ;;  %v1810_v13 = vld [vmem:[#allocation2 + $0x60] sm:$0xff]  ;;  %v1809_v17 = vld [vmem:[#allocation2 + $0x58] sm:$0xff]  ;;  %v1800_v19 = vld [vmem:[#allocation2 + $0x10] sm:$0xff] }
  0x12   :  { %502 = vmatpush.bf16.msra.mxu1 %v1812_v4  ;;  %v1818_v14 = vld [vmem:[#allocation2 + $0xa0] sm:$0xff]  ;;  %v1817_v18 = vld [vmem:[#allocation2 + $0x98] sm:$0xff]  ;;  %v1808_v20 = vld [vmem:[#allocation2 + $0x50] sm:$0xff] }
  0x13   :  { %515 = vmatpush.bf16.msra.mxu2 %v1820_v5  ;;  %v1826_v15 = vld [vmem:[#allocation2 + $0xe0] sm:$0xff]  ;;  %v1825_v21 = vld [vmem:[#allocation2 + $0xd8] sm:$0xff]  ;;  %v1816_v22 = vld [vmem:[#allocation2 + $0x90] sm:$0xff] }
  0x14   :  { %528 = vmatpush.bf16.msra.mxu3 %v1828_v7  ;;  %v1824_v23 = vld [vmem:[#allocation2 + $0xd0] sm:$0xff]  ;;  %v1799_v24 = vld [vmem:[#allocation2 + $0x8] sm:$0xff]  ;;  %v60_v26 = vld [vmem:[%s2168_s0] sm:$0xff] }
  0x15   :  { %490 = vmatpush.bf16.msra.mxu0 %v1803_v8  ;;  %v1807_v25 = vld [vmem:[#allocation2 + $0x48] sm:$0xff]  ;;  %v170_v29 = vunpack.c.l.b16 %v60_v26  ;;  %v171_v31 = vunpack.c.h.b16 %v60_v26  ;;  %v1798_v32 = vld [vmem:[#allocation2] sm:$0xff]  ;;  %v1837_v34 = vld [vmem:[#allocation2 + $0x138] sm:$0xff] }
  0x16   :  { %503 = vmatpush.bf16.msra.mxu1 %v1811_v9  ;;  %v1815_v27 = vld [vmem:[#allocation2 + $0x88] sm:$0xff]  ;;  %v1806_v33 = vld [vmem:[#allocation2 + $0x40] sm:$0xff]  ;;  %v1845_v35 = vld [vmem:[#allocation2 + $0x178] sm:$0xff] }
  0x17   :  { %516 = vmatpush.bf16.msra.mxu2 %v1819_v10  ;;  %v61_v28 = vld [vmem:[%s2168_s0 + $0x8] sm:$0xff]  ;;  %v1814_v36 = vld [vmem:[#allocation2 + $0x80] sm:$0xff]  ;;  %v177_v38 = vpack.c.b16 %v170_v29, %v170_v29  ;;  %v178_v39 = vpack.c.b16 %v171_v31, %v171_v31  ;;  %v1836_v43 = vld [vmem:[#allocation2 + $0x130] sm:$0xff] }
  0x18   :  { %529 = vmatpush.bf16.msra.mxu3 %v1827_v11  ;;  %v1823_v30 = vld [vmem:[#allocation2 + $0xc8] sm:$0xff]  ;;  %v172_v37 = vunpack.c.l.b16 %v61_v28  ;;  %v173_v40 = vunpack.c.h.b16 %v61_v28  ;;  %v1822_v41 = vld [vmem:[#allocation2 + $0xc0] sm:$0xff]  ;;  %v1844_v44 = vld [vmem:[#allocation2 + $0x170] sm:$0xff] }
  0x19   :  { %491 = vmatpush.bf16.msra.mxu0 %v1802_v12  ;;  %v1846_v42 = vld [vmem:[#allocation2 + $0x180] sm:$0xff]  ;;  %v1835_v47 = vld [vmem:[#allocation2 + $0x128] sm:$0xff]  ;;  %v63_v51 = vld [vmem:[%s2168_s0 + $0x18] sm:$0xf] }
  0x1a   :  { %504 = vmatpush.bf16.msra.mxu1 %v1810_v13  ;;  %v179_v45 = vpack.c.b16 %v172_v37, %v172_v37  ;;  %v180_v46 = vpack.c.b16 %v173_v40, %v173_v40  ;;  %v1843_v48 = vld [vmem:[#allocation2 + $0x168] sm:$0xff]  ;;  %v1834_v49 = vld [vmem:[#allocation2 + $0x120] sm:$0xff]  ;;  %v1833_v52 = vld [vmem:[#allocation2 + $0x118] sm:$0xff]  ;;  %v176_v54 = vunpack.c.l.b16 %v63_v51 }
  0x1b   :  { %517 = vmatpush.bf16.msra.mxu2 %v1818_v14  ;;  %v1842_v50 = vld [vmem:[#allocation2 + $0x160] sm:$0xff]  ;;  %v1841_v53 = vld [vmem:[#allocation2 + $0x158] sm:$0xff]  ;;  %v1832_v55 = vld [vmem:[#allocation2 + $0x110] sm:$0xff] }
  0x1c   :  { %530 = vmatpush.bf16.msra.mxu3 %v1826_v15  ;;  %v1840_v56 = vld [vmem:[#allocation2 + $0x150] sm:$0xff]  ;;  %v183_v57 = vpack.c.b16 %v176_v54, %v176_v54  ;;  %v1831_v58 = vld [vmem:[#allocation2 + $0x108] sm:$0xff]  ;;  %v1830_v63 = vld [vmem:[#allocation2 + $0x100] sm:$0xff] }
  0x1d   :  { %492 = vmatpush.bf16.msra.mxu0 %v1801_v16  ;;  %v1839_v59 = vld [vmem:[#allocation2 + $0x148] sm:$0xff]  ;;  %v62_v60 = vld [vmem:[%s2168_s0 + $0x10] sm:$0xff]  ;;  %v1838_v0 = vld [vmem:[#allocation2 + $0x140] sm:$0xff] }
  0x1e   :  { %505 = vmatpush.bf16.msra.mxu1 %v1809_v17  ;;  %v174_v61 = vunpack.c.l.b16 %v62_v60  ;;  %v175_v62 = vunpack.c.h.b16 %v62_v60  ;;  %v1854_v5 = vld [vmem:[#allocation5 + $0x38] sm:$0xff]  ;;  %v1853_v10 = vld [vmem:[#allocation5 + $0x30] sm:$0xff]  ;;  %v1852_v12 = vld [vmem:[#allocation5 + $0x28] sm:$0xff] }
  0x1f   :  { %518 = vmatpush.bf16.msra.mxu2 %v1817_v18  ;;  %v1916_v11 = vld [vmem:[%s2170_s2] ss:$0 sm:$0xff]  ;;  %v1851_v15 = vld [vmem:[#allocation5 + $0x20] sm:$0xff] }
  0x20   :  { %531 = vmatpush.bf16.msra.mxu3 %v1825_v21  ;;  %v181_v1 = vpack.c.b16 %v174_v61, %v174_v61  ;;  %v182_v2 = vpack.c.b16 %v175_v62, %v175_v62  ;;  %v1850_v18 = vld [vmem:[#allocation5 + $0x18] sm:$0xff]  ;;  %v1847_v28 = vld [vmem:[#allocation5] sm:$0xff] }
  0x21   :  { %493 = vmatpush.bf16.msra.mxu0 %v1800_v19 }
  0x22   :  { %506 = vmatpush.bf16.msra.mxu1 %v1808_v20  ;;  %v1849_v20 = vld [vmem:[#allocation5 + $0x10] sm:$0xff] }
  0x23   :  { %519 = vmatpush.bf16.msra.mxu2 %v1816_v22 }
  0x24   :  { %532 = vmatpush.bf16.msra.mxu3 %v1824_v23  ;;  %v1848_v23 = vld [vmem:[#allocation5 + $0x8] sm:$0xff] }
  0x25   :  { %494 = vmatpush.bf16.msra.mxu0 %v1799_v24 }
  0x26   :  { %507 = vmatpush.bf16.msra.mxu1 %v1807_v25 }
  0x27   :  { %520 = vmatpush.bf16.msra.mxu2 %v1815_v27 }
  0x28   :  { %533 = vmatpush.bf16.msra.mxu3 %v1823_v30 }
  0x29   :  { %495 = vmatpush.bf16.msra.mxu0 %v1798_v32 }
  0x2a   :  { %508 = vmatpush.bf16.msra.mxu1 %v1806_v33 }
  0x2b   :  { %521 = vmatpush.bf16.msra.mxu2 %v1814_v36 }
  0x2c   :  { %496 = vmatmul.bf16.vlgmr.msra.gmra.mxu0 %v177_v38  ;;  %534 = vmatpush.bf16.msra.mxu3 %v1822_v41 }
  0x2d   :  { %540 = vmatpush.bf16.msrb.mxu0 %v1837_v34  ;;  %509 = vmatmul.bf16.vlgmr.msra.gmra.mxu1 %v178_v39 }
  0x2e   :  { %553 = vmatpush.bf16.msrb.mxu1 %v1845_v35  ;;  %522 = vmatmul.bf16.vlgmr.msra.gmra.mxu2 %v179_v45  ;;  %v1860_v45 = vld [vmem:[#allocation5 + $0x68] sm:$0xff] }
  0x2f   :  { %573 = vmatpush.bf16.msrb.mxu2 %v1846_v42  ;;  %535 = vmatmul.bf16.vlgmr.msra.gmra.mxu3 %v180_v46  ;;  %v1859_v46 = vld [vmem:[#allocation5 + $0x60] sm:$0xff] }
  0x30   :  { %657 = vmatpush.bf16.msrb.mxu3 %v1854_v5  ;;  %v1866_v5 = vld [vmem:[#allocation5 + $0x98] sm:$0xff] }
  0x31   :  { %541 = vmatpush.bf16.msrb.mxu0 %v1836_v43  ;;  %v1862_v43 = vld [vmem:[#allocation5 + $0x78] sm:$0xff] }
  0x32   :  { %554 = vmatpush.bf16.msrb.mxu1 %v1844_v44  ;;  %v1861_v44 = vld [vmem:[#allocation5 + $0x70] sm:$0xff] }
  0x33   :  { %750 = vmatpush.bf16.msra.mxu2 %v1862_v43 }
  0x34   :  { %658 = vmatpush.bf16.msrb.mxu3 %v1853_v10 }
  0x35   :  { %542 = vmatpush.bf16.msrb.mxu0 %v1835_v47  ;;  %v1858_v47 = vld [vmem:[#allocation5 + $0x58] sm:$0xff] }
  0x36   :  { %555 = vmatpush.bf16.msrb.mxu1 %v1843_v48  ;;  %v1857_v48 = vld [vmem:[#allocation5 + $0x50] sm:$0xff] }
  0x37   :  { %751 = vmatpush.bf16.msra.mxu2 %v1861_v44 }
  0x38   :  { %659 = vmatpush.bf16.msrb.mxu3 %v1852_v12 }
  0x39   :  { %543 = vmatpush.bf16.msrb.mxu0 %v1834_v49  ;;  %v1917_v49 = vld [vmem:[%s2172_s4] ss:$0 sm:$0xff] }
  0x3a   :  { %556 = vmatpush.bf16.msrb.mxu1 %v1842_v50  ;;  %v1856_v50 = vld [vmem:[#allocation5 + $0x48] sm:$0xff] }
  0x3b   :  { %752 = vmatpush.bf16.msra.mxu2 %v1860_v45  ;;  %v1886_v45 = vld [vmem:[#allocation5 + $0x138] sm:$0xff] }
  0x3c   :  { %660 = vmatpush.bf16.msrb.mxu3 %v1851_v15 }
  0x3d   :  { %544 = vmatpush.bf16.msrb.mxu0 %v1833_v52 }
  0x3e   :  { %557 = vmatpush.bf16.msrb.mxu1 %v1841_v53  ;;  %1535 = vmatmul.msk.bf16.vlgmr.msrb.gmra.mxu2 %vm484_vm0, %v183_v57  ;;  %v1855_v53 = vld [vmem:[#allocation5 + $0x40] sm:$0xff] }
  0x3f   :  { %753 = vmatpush.bf16.msra.mxu2 %v1859_v46  ;;  %v1885_v46 = vld [vmem:[#allocation5 + $0x130] sm:$0xff] }
  0x40   :  { %661 = vmatpush.bf16.msrb.mxu3 %v1850_v18 }
  0x41   :  { %545 = vmatpush.bf16.msrb.mxu0 %v1832_v55 }
  0x42   :  { %558 = vmatpush.bf16.msrb.mxu1 %v1840_v56 }
  0x43   :  { %754 = vmatpush.bf16.msra.mxu2 %v1858_v47  ;;  %v1884_v47 = vld [vmem:[#allocation5 + $0x128] sm:$0xff] }
  0x44   :  { %662 = vmatpush.bf16.msrb.mxu3 %v1849_v20 }
  0x45   :  { %546 = vmatpush.bf16.msrb.mxu0 %v1831_v58 }
  0x46   :  { %559 = vmatpush.bf16.msrb.mxu1 %v1839_v59 }
  0x47   :  { %755 = vmatpush.bf16.msra.mxu2 %v1857_v48  ;;  %v1883_v48 = vld [vmem:[#allocation5 + $0x120] sm:$0xff] }
  0x48   :  { %663 = vmatpush.bf16.msrb.mxu3 %v1848_v23  ;;  %v1878_v23 = vld [vmem:[#allocation5 + $0xf8] sm:$0xff] }
  0x49   :  { %547 = vmatpush.bf16.msrb.mxu0 %v1830_v63 }
  0x4a   :  { %560 = vmatpush.bf16.msrb.mxu1 %v1838_v0 }
  0x4b   :  { %756 = vmatpush.bf16.msra.mxu2 %v1856_v50  ;;  %v1881_v50 = vld [vmem:[#allocation5 + $0x110] sm:$0xff] }
  0x4c   :  { %548 = vmatmul.bf16.vlgmr.msrb.gmra.mxu0 %v181_v1  ;;  %664 = vmatpush.bf16.msrb.mxu3 %v1847_v28  ;;  %v1870_v1 = vld [vmem:[#allocation5 + $0xb8] sm:$0xff]  ;;  %v1873_v28 = vld [vmem:[#allocation5 + $0xd0] sm:$0xff] }
  0x4d   :  { %561 = vmatmul.bf16.vlgmr.msrb.gmra.mxu1 %v182_v2  ;;  %843 = vmatpush.bf16.msra.mxu0 %v1870_v1  ;;  %v1869_v2 = vld [vmem:[#allocation5 + $0xb0] sm:$0xff] }
  0x4e   :  { %936 = vmatpush.bf16.msra.mxu1 %v1878_v23 }
  0x4f   :  { %757 = vmatpush.bf16.msra.mxu2 %v1855_v53 }
  0x50   :  { %1029 = vmatpush.bf16.msra.mxu3 %v1886_v45 }
  0x51   :  { %844 = vmatpush.bf16.msra.mxu0 %v1869_v2 }
  0x54   :  { %1030 = vmatpush.bf16.msra.mxu3 %v1885_v46 }
  0x58   :  { %1031 = vmatpush.bf16.msra.mxu3 %v1884_v47  ;;  %v1910_v47 = vld [vmem:[%s2173_s5 + $0x38] sm:$0xff] }
  0x5c   :  { %1032 = vmatpush.bf16.msra.mxu3 %v1883_v48  ;;  %v1909_v48 = vld [vmem:[%s2173_s5 + $0x30] sm:$0xff] }
  0xa9   :  { %v497_v3 = vpop.f32.mrf.mxu0 }
  0xaa   :  { %v510_v4 = vpop.f32.mrf.mxu1  ;;  %v498_v13 = vadd.f32 %v1916_v11, %v497_v3  ;;  %v1868_v3 = vld [vmem:[#allocation5 + $0xa8] sm:$0xff]  ;;  %v1863_v11 = vld [vmem:[#allocation5 + $0x80] sm:$0xff] }
  0xab   :  { %845 = vmatpush.bf16.msra.mxu0 %v1868_v3  ;;  %v1894_v3 = vld [vmem:[#allocation5 + $0x178] sm:$0xff] }
  0xac   :  { %v511_v17 = vadd.f32 %v510_v4, %v498_v13  ;;  %v1867_v4 = vld [vmem:[#allocation5 + $0xa0] sm:$0xff]  ;;  %1122 = vmatpush.bf16.msrb.mxu2 %v1894_v3 }
  0xaf   :  { %846 = vmatpush.bf16.msra.mxu0 %v1867_v4  ;;  %v1893_v4 = vld [vmem:[#allocation5 + $0x170] sm:$0xff] }
  0xb0   :  { %1123 = vmatpush.bf16.msrb.mxu2 %v1893_v4 }
  0xb1   :  { %v499_v6 = vpop.f32.mrf.mxu0  ;;  %v523_v8 = vpop.f32.mrf.mxu2 }
  0xb2   :  { %v512_v7 = vpop.f32.mrf.mxu1  ;;  %v536_v9 = vpop.f32.mrf.mxu3  ;;  %v524_v19 = vadd.f32 %v523_v8, %v511_v17  ;;  %v1865_v6 = vld [vmem:[#allocation5 + $0x90] sm:$0xff]  ;;  %v1864_v8 = vld [vmem:[#allocation5 + $0x88] sm:$0xff] }
  0xb3   :  { %847 = vmatpush.bf16.msra.mxu0 %v1866_v5  ;;  %v1918_v7 = vld [vmem:[%s2172_s4 + $0x1] ss:$0 sm:$0xff]  ;;  %v1892_v5 = vld [vmem:[#allocation5 + $0x168] sm:$0xff] }
  0xb4   :  { %v537_v22 = vadd.f32 %v536_v9, %v524_v19  ;;  %1124 = vmatpush.bf16.msrb.mxu2 %v1892_v5  ;;  %v1924_v5 = vld [vmem:[%s2174_s6] ss:$0 sm:$0xff] }
  0xb7   :  { %848 = vmatpush.bf16.msra.mxu0 %v1865_v6  ;;  %v1891_v6 = vld [vmem:[#allocation5 + $0x160] sm:$0xff] }
  0xb8   :  { %1125 = vmatpush.bf16.msrb.mxu2 %v1891_v6 }
  0xb9   :  { %v525_v14 = vpop.f32.mrf.mxu2 }
  0xba   :  { %v538_v16 = vpop.f32.mrf.mxu3 }
  0xbb   :  { %849 = vmatpush.bf16.msra.mxu0 %v1864_v8  ;;  %v1889_v8 = vld [vmem:[#allocation5 + $0x150] sm:$0xff] }
  0xbf   :  { %850 = vmatpush.bf16.msra.mxu0 %v1863_v11 }
  0xc1   :  { %v575_v21 = vpop.f32.mrf.mxu2 }
  0xc9   :  { %v549_v24 = vpop.f32.mrf.mxu0  ;;  %v577_v29 = vpop.f32.mrf.mxu2 }
  0xca   :  { %v562_v25 = vpop.f32.mrf.mxu1  ;;  %v550_v26 = vadd.f32 %v549_v24, %v537_v22  ;;  %v1877_v24 = vld [vmem:[#allocation5 + $0xf0] sm:$0xff]  ;;  %v1919_v29 = vld [vmem:[%s2172_s4 + $0x2] ss:$0 sm:$0xff] }
  0xcb   :  { %937 = vmatpush.bf16.msra.mxu1 %v1877_v24 }
  0xcc   :  { %v563_v27 = vadd.f32 %v562_v25, %v550_v26  ;;  %v1876_v25 = vld [vmem:[#allocation5 + $0xe8] sm:$0xff]  ;;  %v1875_v26 = vld [vmem:[#allocation5 + $0xe0] sm:$0xff] }
  0xce   :  { %v576_v30 = vadd.f32 %v575_v21, %v563_v27  ;;  %v1874_v27 = vld [vmem:[#allocation5 + $0xd8] sm:$0xff] }
  0xcf   :  { %938 = vmatpush.bf16.msra.mxu1 %v1876_v25  ;;  %v1902_v25 = vld [vmem:[#allocation5 + $0x1b8] sm:$0xff] }
  0xd0   :  { %v579_v31 = vsub.f32 0.0, %v576_v30  ;;  %1215 = vmatpush.bf16.msrb.mxu0 %v1902_v25 }
  0xd1   :  { %v551_v32 = vpop.f32.mrf.mxu0 }
  0xd2   :  { %v564_v33 = vpop.f32.mrf.mxu1  ;;  %v580_v34 = vmul.f32 1.442695, %v579_v31 }
  0xd3   :  { %939 = vmatpush.bf16.msra.mxu1 %v1875_v26  ;;  %v1871_v33 = vld [vmem:[#allocation5 + $0xc0] sm:$0xff]  ;;  %v1901_v26 = vld [vmem:[#allocation5 + $0x1b0] sm:$0xff] }
  0xd4   :  { %1925 = vpow2.f32 %v580_v34  ;;  %1216 = vmatpush.bf16.msrb.mxu0 %v1901_v26 }
  0xd7   :  { %940 = vmatpush.bf16.msra.mxu1 %v1874_v27  ;;  %v1900_v27 = vld [vmem:[#allocation5 + $0x1a8] sm:$0xff] }
  0xd8   :  { %1217 = vmatpush.bf16.msrb.mxu0 %v1900_v27 }
  0xda   :  { %v1926_v35 = vpop.eup %1925 }
  0xdb   :  { %v582_v36 = vadd.f32 1.0, %v1926_v35  ;;  %941 = vmatpush.bf16.msra.mxu1 %v1873_v28  ;;  %v1899_v28 = vld [vmem:[#allocation5 + $0x1a0] sm:$0xff] }
  0xdc   :  { %1218 = vmatpush.bf16.msrb.mxu0 %v1899_v28 }
  0xdd   :  { %1927 = vrcp.f32 %v582_v36 }
  0xe3   :  { %v1928_v37 = vpop.eup %1927 }
  0xe4   :  { %v584_v38 = vadd.f32 1.0, %v1928_v37 }
  0xe6   :  { %1929 = vlog2.f32 %v584_v38 }
  0xec   :  { %v1930_v39 = vpop.eup %1929 }
  0xed   :  { %v586_v40 = vmul.f32 0.6931472, %v1930_v39 }
  0xef   :  { %v587_v41 = vmul.f32 %v586_v40, %v576_v30  ;;  %v1872_v30 = vld [vmem:[#allocation5 + $0xc8] sm:$0xff] }
  0xf0   :  { %942 = vmatpush.bf16.msra.mxu1 %v1872_v30  ;;  %v1897_v30 = vld [vmem:[#allocation5 + $0x190] sm:$0xff] }
  0xf1   :  { %v588_v42 = vpack.c.bf16 %v587_v41, %v587_v41 }
  0xf3   :  { %665 = vmatmul.bf16.vlgmr.msrb.gmra.mxu3 %v588_v42 }
  0xf4   :  { %943 = vmatpush.bf16.msra.mxu1 %v1871_v33 }
  0xf8   :  { %1306 = vmatpush.bf16.msrb.mxu1 %v1910_v47 }
  0xfc   :  { %1307 = vmatpush.bf16.msrb.mxu1 %v1909_v48 }
 0x176   :  { %v666_v51 = vpop.f32.mrf.mxu3 }
 0x177   :  { %v667_v52 = vadd.f32 %v1917_v49, %v666_v51  ;;  %v1882_v49 = vld [vmem:[#allocation5 + $0x118] sm:$0xff] }
 0x178   :  { %1033 = vmatpush.bf16.msra.mxu3 %v1882_v49  ;;  %v1920_v51 = vld [vmem:[%s2172_s4 + $0x3] ss:$0 sm:$0xff]  ;;  %v1908_v49 = vld [vmem:[%s2173_s5 + $0x28] sm:$0xff] }
 0x179   :  { %v670_v54 = vsub.f32 0.0, %v667_v52  ;;  %1308 = vmatpush.bf16.msrb.mxu1 %v1908_v49 }
 0x17b   :  { %v671_v55 = vmul.f32 1.442695, %v670_v54 }
 0x17c   :  { %1034 = vmatpush.bf16.msra.mxu3 %v1881_v50  ;;  %v1907_v50 = vld [vmem:[%s2173_s5 + $0x20] sm:$0xff] }
 0x17d   :  { %1931 = vpow2.f32 %v671_v55  ;;  %v1879_v55 = vld [vmem:[#allocation5 + $0x100] sm:$0xff]  ;;  %1309 = vmatpush.bf16.msrb.mxu1 %v1907_v50 }
 0x17e   :  { %v668_v56 = vpop.f32.mrf.mxu3 }
 0x183   :  { %v1932_v57 = vpop.eup %1931 }
 0x184   :  { %v673_v58 = vadd.f32 1.0, %v1932_v57 }
 0x186   :  { %1933 = vrcp.f32 %v673_v58 }
 0x18c   :  { %v1934_v59 = vpop.eup %1933 }
 0x18d   :  { %v675_v60 = vadd.f32 1.0, %v1934_v59 }
 0x18f   :  { %1935 = vlog2.f32 %v675_v60 }
 0x195   :  { %v1936_v61 = vpop.eup %1935 }
 0x196   :  { %v677_v62 = vmul.f32 0.6931472, %v1936_v61 }
 0x198   :  { %v678_v63 = vmul.f32 %v677_v62, %v667_v52  ;;  %v1880_v52 = vld [vmem:[#allocation5 + $0x108] sm:$0xff] }
 0x199   :  { %1035 = vmatpush.bf16.msra.mxu3 %v1880_v52  ;;  %v1905_v52 = vld [vmem:[%s2173_s5 + $0x10] sm:$0xff] }
 0x19a   :  { %v679_v0 = vpack.c.bf16 %v678_v63, %v678_v63 }
 0x19c   :  { %758 = vmatmul.bf16.vlgmr.msra.gmra.mxu2 %v679_v0 }
 0x19d   :  { %1036 = vmatpush.bf16.msra.mxu3 %v1879_v55 }
 0x21f   :  { %v759_v9 = vpop.f32.mrf.mxu2 }
 0x220   :  { %v760_v10 = vadd.f32 %v1918_v7, %v759_v9  ;;  %v1890_v7 = vld [vmem:[#allocation5 + $0x158] sm:$0xff] }
 0x221   :  { %1126 = vmatpush.bf16.msrb.mxu2 %v1890_v7  ;;  %v1921_v9 = vld [vmem:[%s2172_s4 + $0x4] ss:$0 sm:$0xff] }
 0x222   :  { %v763_v12 = vsub.f32 0.0, %v760_v10 }
 0x224   :  { %v764_v13 = vmul.f32 1.442695, %v763_v12 }
 0x225   :  { %1127 = vmatpush.bf16.msrb.mxu2 %v1889_v8 }
 0x226   :  { %1937 = vpow2.f32 %v764_v13  ;;  %v1887_v13 = vld [vmem:[#allocation5 + $0x140] sm:$0xff] }
 0x227   :  { %v761_v14 = vpop.f32.mrf.mxu2 }
 0x22c   :  { %v1938_v15 = vpop.eup %1937 }
 0x22d   :  { %v766_v16 = vadd.f32 1.0, %v1938_v15 }
 0x22f   :  { %1939 = vrcp.f32 %v766_v16 }
 0x235   :  { %v1940_v17 = vpop.eup %1939 }
 0x236   :  { %v768_v18 = vadd.f32 1.0, %v1940_v17 }
 0x238   :  { %1941 = vlog2.f32 %v768_v18 }
 0x23e   :  { %v1942_v19 = vpop.eup %1941 }
 0x23f   :  { %v770_v20 = vmul.f32 0.6931472, %v1942_v19 }
 0x241   :  { %v771_v21 = vmul.f32 %v770_v20, %v760_v10  ;;  %v1888_v10 = vld [vmem:[#allocation5 + $0x148] sm:$0xff] }
 0x242   :  { %1128 = vmatpush.bf16.msrb.mxu2 %v1888_v10 }
 0x243   :  { %v772_v22 = vpack.c.bf16 %v771_v21, %v771_v21 }
 0x245   :  { %851 = vmatmul.bf16.vlgmr.msra.gmra.mxu0 %v772_v22 }
 0x246   :  { %1129 = vmatpush.bf16.msrb.mxu2 %v1887_v13 }
 0x2c2   :  { %v852_v31 = vpop.f32.mrf.mxu0 }
 0x2c3   :  { %v853_v32 = vadd.f32 %v1919_v29, %v852_v31  ;;  %v1898_v29 = vld [vmem:[#allocation5 + $0x198] sm:$0xff] }
 0x2c4   :  { %1219 = vmatpush.bf16.msrb.mxu0 %v1898_v29  ;;  %v1922_v31 = vld [vmem:[%s2172_s4 + $0x5] ss:$0 sm:$0xff] }
 0x2c5   :  { %v856_v34 = vsub.f32 0.0, %v853_v32 }
 0x2c7   :  { %v857_v35 = vmul.f32 1.442695, %v856_v34 }
 0x2c8   :  { %1220 = vmatpush.bf16.msrb.mxu0 %v1897_v30 }
 0x2c9   :  { %1943 = vpow2.f32 %v857_v35  ;;  %v1895_v35 = vld [vmem:[#allocation5 + $0x180] sm:$0xff] }
 0x2ca   :  { %v854_v36 = vpop.f32.mrf.mxu0 }
 0x2cf   :  { %v1944_v37 = vpop.eup %1943 }
 0x2d0   :  { %v859_v38 = vadd.f32 1.0, %v1944_v37 }
 0x2d2   :  { %1945 = vrcp.f32 %v859_v38 }
 0x2d8   :  { %v1946_v39 = vpop.eup %1945 }
 0x2d9   :  { %v861_v40 = vadd.f32 1.0, %v1946_v39 }
 0x2db   :  { %1947 = vlog2.f32 %v861_v40 }
 0x2e1   :  { %v1948_v41 = vpop.eup %1947 }
 0x2e2   :  { %v863_v42 = vmul.f32 0.6931472, %v1948_v41 }
 0x2e4   :  { %v864_v43 = vmul.f32 %v863_v42, %v853_v32  ;;  %v1896_v32 = vld [vmem:[#allocation5 + $0x188] sm:$0xff] }
 0x2e5   :  { %1221 = vmatpush.bf16.msrb.mxu0 %v1896_v32 }
 0x2e6   :  { %v865_v44 = vpack.c.bf16 %v864_v43, %v864_v43 }
 0x2e8   :  { %944 = vmatmul.bf16.vlgmr.msra.gmra.mxu1 %v865_v44 }
 0x2e9   :  { %1222 = vmatpush.bf16.msrb.mxu0 %v1895_v35 }
 0x365   :  { %v945_v53 = vpop.f32.mrf.mxu1 }
 0x366   :  { %v946_v54 = vadd.f32 %v1920_v51, %v945_v53  ;;  %v1906_v51 = vld [vmem:[%s2173_s5 + $0x18] sm:$0xff]  ;;  %v1923_v53 = vld [vmem:[%s2172_s4 + $0x6] ss:$0 sm:$0xff] }
 0x367   :  { %1310 = vmatpush.bf16.msrb.mxu1 %v1906_v51 }
 0x368   :  { %v949_v56 = vsub.f32 0.0, %v946_v54 }
 0x36a   :  { %v950_v57 = vmul.f32 1.442695, %v949_v56 }
 0x36b   :  { %1311 = vmatpush.bf16.msrb.mxu1 %v1905_v52 }
 0x36c   :  { %1949 = vpow2.f32 %v950_v57  ;;  %v1903_v57 = vld [vmem:[%s2173_s5] sm:$0xff] }
 0x36d   :  { %v947_v58 = vpop.f32.mrf.mxu1 }
 0x372   :  { %v1950_v59 = vpop.eup %1949 }
 0x373   :  { %v952_v60 = vadd.f32 1.0, %v1950_v59 }
 0x375   :  { %1951 = vrcp.f32 %v952_v60 }
 0x37b   :  { %v1952_v61 = vpop.eup %1951 }
 0x37c   :  { %v954_v62 = vadd.f32 1.0, %v1952_v61 }
 0x37e   :  { %1953 = vlog2.f32 %v954_v62 }
 0x384   :  { %v1954_v63 = vpop.eup %1953 }
 0x385   :  { %v956_v0 = vmul.f32 0.6931472, %v1954_v63 }
 0x387   :  { %v957_v1 = vmul.f32 %v956_v0, %v946_v54  ;;  %v1904_v54 = vld [vmem:[%s2173_s5 + $0x8] sm:$0xff]  ;;  %s2055_s5 = smov [#allocation7]  }
 0x388   :  { %1312 = vmatpush.bf16.msrb.mxu1 %v1904_v54  ;;  %s1326_s23 = sshll.u32 %s2055_s5, 4  ;;  %s1327_s23 = int_to_ptr.vmem [resolvable:$true] %s1326_s23 }
 0x389   :  { %v958_v2 = vpack.c.bf16 %v957_v1, %v957_v1 }
 0x38b   :  { %1037 = vmatmul.bf16.vlgmr.msra.gmra.mxu3 %v958_v2 }
 0x38c   :  { %1313 = vmatpush.bf16.msrb.mxu1 %v1903_v57 }
 0x40e   :  { %v1038_v11 = vpop.f32.mrf.mxu3 }
 0x40f   :  { %v1039_v12 = vadd.f32 %v1921_v9, %v1038_v11 }
 0x411   :  { %v1042_v14 = vsub.f32 0.0, %v1039_v12 }
 0x413   :  { %v1043_v15 = vmul.f32 1.442695, %v1042_v14 }
 0x415   :  { %1955 = vpow2.f32 %v1043_v15 }
 0x416   :  { %v1040_v16 = vpop.f32.mrf.mxu3 }
 0x41b   :  { %v1956_v17 = vpop.eup %1955 }
 0x41c   :  { %v1045_v18 = vadd.f32 1.0, %v1956_v17 }
 0x41e   :  { %1957 = vrcp.f32 %v1045_v18 }
 0x424   :  { %v1958_v19 = vpop.eup %1957 }
 0x425   :  { %v1047_v20 = vadd.f32 1.0, %v1958_v19 }
 0x427   :  { %1959 = vlog2.f32 %v1047_v20 }
 0x42d   :  { %v1960_v21 = vpop.eup %1959 }
 0x42e   :  { %v1049_v22 = vmul.f32 0.6931472, %v1960_v21 }
 0x430   :  { %v1050_v23 = vmul.f32 %v1049_v22, %v1039_v12 }
 0x432   :  { %v1051_v24 = vpack.c.bf16 %v1050_v23, %v1050_v23 }
 0x434   :  { %1130 = vmatmul.bf16.vlgmr.msrb.gmra.mxu2 %v1051_v24 }
 0x4b7   :  { %v1131_v33 = vpop.f32.mrf.mxu2 }
 0x4b8   :  { %v1132_v34 = vadd.f32 %v1922_v31, %v1131_v33 }
 0x4ba   :  { %v1135_v36 = vsub.f32 0.0, %v1132_v34 }
 0x4bc   :  { %v1136_v37 = vmul.f32 1.442695, %v1135_v36 }
 0x4be   :  { %1961 = vpow2.f32 %v1136_v37 }
 0x4bf   :  { %v1133_v38 = vpop.f32.mrf.mxu2 }
 0x4c4   :  { %v1962_v39 = vpop.eup %1961 }
 0x4c5   :  { %v1138_v40 = vadd.f32 1.0, %v1962_v39 }
 0x4c7   :  { %1963 = vrcp.f32 %v1138_v40 }
 0x4cd   :  { %v1964_v41 = vpop.eup %1963 }
 0x4ce   :  { %v1140_v42 = vadd.f32 1.0, %v1964_v41 }
 0x4d0   :  { %1965 = vlog2.f32 %v1140_v42 }
 0x4d6   :  { %v1966_v43 = vpop.eup %1965 }
 0x4d7   :  { %v1142_v44 = vmul.f32 0.6931472, %v1966_v43 }
 0x4d9   :  { %v1143_v45 = vmul.f32 %v1142_v44, %v1132_v34 }
 0x4db   :  { %v1144_v46 = vpack.c.bf16 %v1143_v45, %v1143_v45 }
 0x4dd   :  { %1223 = vmatmul.bf16.vlgmr.msrb.gmra.mxu0 %v1144_v46 }
 0x55a   :  { %v1224_v55 = vpop.f32.mrf.mxu0 }
 0x55b   :  { %v1225_v56 = vadd.f32 %v1923_v53, %v1224_v55 }
 0x55d   :  { %v1228_v58 = vsub.f32 0.0, %v1225_v56 }
 0x55f   :  { %v1229_v59 = vmul.f32 1.442695, %v1228_v58 }
 0x561   :  { %1967 = vpow2.f32 %v1229_v59 }
 0x562   :  { %v1226_v60 = vpop.f32.mrf.mxu0 }
 0x567   :  { %v1968_v61 = vpop.eup %1967 }
 0x568   :  { %v1231_v62 = vadd.f32 1.0, %v1968_v61 }
 0x56a   :  { %1969 = vrcp.f32 %v1231_v62 }
 0x570   :  { %v1970_v63 = vpop.eup %1969 }
 0x571   :  { %v1233_v0 = vadd.f32 1.0, %v1970_v63 }
 0x573   :  { %1971 = vlog2.f32 %v1233_v0 }
 0x579   :  { %v1972_v1 = vpop.eup %1971 }
 0x57a   :  { %v1235_v2 = vmul.f32 0.6931472, %v1972_v1 }
 0x57c   :  { %v1236_v3 = vmul.f32 %v1235_v2, %v1225_v56 }
 0x57e   :  { %v1237_v4 = vpack.c.bf16 %v1236_v3, %v1236_v3 }
 0x580   :  { %1314 = vmatmul.bf16.vlgmr.msrb.gmra.mxu1 %v1237_v4 }
 0x5fd   :  { %v1315_v6 = vpop.f32.mrf.mxu1 }
 0x5fe   :  { %v1316_v7 = vadd.f32 %v1924_v5, %v1315_v6 }
 0x600   :  { %1320 = vst.msk [vmem:[#allocation7] sm:$0xff] %vm1319_vm1, %v1316_v7 }
 0x601   :  { %1331 = dma.vmem_to_hbm [thread:$0]  %s1327_s23, 128, %s1329_s26, [#allocation4]  }
 0x605   :  { %v1317_v8 = vpop.f32.mrf.mxu1 }
 0x606   :  { %2049 = dma.done.wait [#allocation4], 128  }
 0x607   :  { %2050 = vsyncadd [#allocation4], 4294967168 }
 0x608   :  { %1336 = vsyncpa [#allocation3], 1 }
 0x609   :  { %1337 = vsyncpa [#allocation6], 1 }
 0x60a   :  { %1338 = vsyncpa [#allocation4], 1 }

</bundles_post_ra>
